<compile_context>
chip_gen: v7x
topology: tpu7x:2x2x1
jax: 0.10.0
libtpu: 0.0.40
codegen_flags: <defaults>
</compile_context>

<pallas_src>
import jax
import jax.numpy as jnp
import numpy as np
from jax import lax
from jax.experimental import pallas as pl
from jax.experimental.pallas import tpu as pltpu


def _padding(downsample, kernel_size):
    """Same formula as the PyTorch module."""
    return max(0, int(np.floor((kernel_size - downsample + 1) / 2)))


def _round_up(v, m):
    return (v + m - 1) // m * m


def _make_kernel(B, Kq, stride, Mrows, G_pad, Lout):
    """Build the per-grid-step kernel body (all sizes are static Python ints)."""
    f32 = jnp.float32
    bf16 = jnp.bfloat16

    def kernel(x1_ref, yw_ref, w1_ref, w2_ref, wskip_ref, s2_ref, b2_ref,
               xout_ref, yout_ref):
        # ---- conv1 + bn1 (scale/shift folded into the im2col weight) + relu: one matmul ----
        h = jnp.dot(x1_ref[...], w1_ref[...], preferred_element_type=f32)
        h = jnp.maximum(h, 0.0).astype(bf16)    # TODO(synk): dropout1 is identity (eval mode)

        # ---- conv2: Kq super-tap matmuls over contiguous row windows (stride folded into
        #      the super-row channel packing -> no strided loads) ----
        acc = jnp.dot(h[0:Mrows], w2_ref[0], preferred_element_type=f32)
        for q in range(1, Kq):
            acc = acc + jnp.dot(h[q:q + Mrows], w2_ref[q], preferred_element_type=f32)

        # ---- skip path: maxpool over the (non-minor) window axis with VPU maxes, 1x1 conv ----
        pool = yw_ref[0]
        for p in range(1, stride):
            pool = jnp.maximum(pool, yw_ref[p])
        acc = acc + jnp.dot(pool, wskip_ref[...], preferred_element_type=f32)

        # ---- epilogue: 16-aligned per-sample slices, bn2 + relu, bf16 lane-dense outputs ----
        s2 = s2_ref[...]
        b2 = b2_ref[...]
        for b in range(B):
            y2 = acc[b * G_pad:b * G_pad + Lout]
            yout_ref[b] = y2.astype(bf16)
            xout_ref[b] = jnp.maximum(y2 * s2 + b2, 0.0).astype(bf16)  # dropout2 = identity (eval)

    return kernel


def resblock1d_forward(x_ncl, y_ncl, params, *, kernel_size, downsample, eps=1e-5):
    """Pallas-backed eval-mode forward.  Inputs/outputs use the PyTorch NCL layout."""
    N, Cin, L = (int(d) for d in x_ncl.shape)
    Cout = int(params["conv1_w"].shape[0])
    K = int(kernel_size)
    stride = int(downsample)
    assert K % 2 == 1, "only odd kernel_size is supported (same as the PyTorch module)"

    pad1 = _padding(1, K)
    pad2 = _padding(stride, K)
    Lout = (L + 2 * pad2 - K) // stride + 1
    Lskip = L // stride
    assert Lout == Lskip, "residual add requires matching lengths"

    Kq = (K - 1) // stride + 1              # number of conv2 "super taps"
    G = Lout + Kq - 1                       # super rows needed per sample
    G_pad = _round_up(G, 16)                # 16-aligned per-sample row stride (bf16 sublane)
    T = _round_up(max(Kq - 1, 1), 16)       # zero tail so shifted tap slices stay in-bounds

    Ck1 = stride * (K * Cin + 1)            # conv1 im2col contraction (taps x channels + bias)
    Ck1p = _round_up(Ck1, 128)
    Cs = stride * Cout                      # conv1 super-row output channels
    Csp = _round_up(Cs, 128)
    Cpi = _round_up(Cin, 128)
    Cpo = _round_up(Cout, 128)

    f32, bf16 = jnp.float32, jnp.bfloat16

    # ---- per-step VMEM budget -> batch tile B (and >=2 grid steps whenever N >= 2) ----
    def footprint(b):
        mrows = b * G_pad
        mrows_t = mrows + T
        inp = mrows_t * Ck1p * 2 + stride * mrows * Cpi * 2               # bf16 input blocks
        outp = 2 * b * Lout * Cpo * 2                                     # two bf16 outputs
        wts = (Ck1p * Csp + Kq * Csp * Cpo + Cpi * Cpo) * 2 + 2 * Cpo * 4
        tmp = mrows_t * Csp * (4 + 2) + mrows * Cpo * 4 + mrows * Cpi * 2  # h(f32+bf16)+acc+pool
        return 2 * (inp + outp + wts) + tmp                               # double-buffered + temps

    budget = 40 << 20
    B = 1
    for b in range(1, N + 1):
        if N % b:
            continue
        if N >= 2 and N // b < 2:
            continue
        if footprint(b) <= budget:
            B = b
    NB = N // B
    Mrows = B * G_pad
    MrowsT = Mrows + T

    # ---- conv1 im2col (built once in XLA), rows in conv2 super-row order, bias column ----
    x_nlc = jnp.transpose(x_ncl, (0, 2, 1)).astype(f32)                   # (N, L, Cin)
    xp1 = jnp.pad(x_nlc, ((0, 0), (pad1, pad1), (0, 0)))
    win = jnp.stack([xp1[:, k:k + L, :] for k in range(K)], axis=2)       # (N, L, K, Cin)
    win = win.reshape(N, L, K * Cin)
    rows = jnp.concatenate([win, jnp.ones((N, L, 1), f32)], axis=-1)      # (N, L, K*Cin+1)
    total_r = G * stride
    back = max(0, total_r - pad2 - L)
    rows = jnp.pad(rows, ((0, 0), (pad2, back), (0, 0)))[:, :total_r, :]  # conv2 "same" padding rows = 0
    sup = rows.reshape(N, G, Ck1)                                         # super-row packing
    sup = jnp.pad(sup, ((0, 0), (0, G_pad - G), (0, Ck1p - Ck1)))
    x1 = sup.reshape(NB, Mrows, Ck1p)
    x1 = jnp.pad(x1, ((0, 0), (0, T), (0, 0))).astype(bf16)               # (NB, MrowsT, Ck1p)

    # ---- skip path: maxpool windows with the window axis NOT in the minor two dims ----
    y_nlc = jnp.transpose(y_ncl, (0, 2, 1)).astype(f32)                   # (N, L, Cin)
    yw = y_nlc[:, :Lskip * stride, :].reshape(N, Lskip, stride, Cin)
    yw = jnp.transpose(yw, (0, 2, 1, 3))                                  # (N, stride, Lskip, Cin)
    yw = jnp.pad(yw, ((0, 0), (0, 0), (0, G_pad - Lskip), (0, Cpi - Cin)))
    yw = yw.reshape(NB, B, stride, G_pad, Cpi)
    yw = jnp.transpose(yw, (0, 2, 1, 3, 4)).reshape(NB, stride, Mrows, Cpi).astype(bf16)

    # ---- weights: bn1 folded into conv1's im2col weight; conv2 packed into super-taps ----
    s1 = params["bn1_g"].astype(f32) / jnp.sqrt(params["bn1_v"].astype(f32) + eps)
    sh1 = params["bn1_b"].astype(f32) - params["bn1_m"].astype(f32) * s1
    w1t = jnp.transpose(params["conv1_w"].astype(f32), (2, 1, 0)).reshape(K * Cin, Cout)
    blk = jnp.concatenate([w1t * s1[None, :], sh1[None, :]], axis=0)      # (K*Cin+1, Cout)
    w1mega = jnp.zeros((Ck1, Cs), f32)
    for p in range(stride):                                               # block-diagonal per phase
        w1mega = w1mega.at[p * (K * Cin + 1):(p + 1) * (K * Cin + 1),
                           p * Cout:(p + 1) * Cout].set(blk)
    w1mega = jnp.pad(w1mega, ((0, Ck1p - Ck1), (0, Csp - Cs))).astype(bf16)

    w2t = jnp.transpose(params["conv2_w"].astype(f32), (2, 1, 0))         # (K, Cout, Cout)
    w2s = jnp.zeros((Kq, Cs, Cout), f32)
    for q in range(Kq):
        for p in range(stride):
            k = q * stride + p
            if k < K:
                w2s = w2s.at[q, p * Cout:(p + 1) * Cout, :].set(w2t[k])
    w2s = jnp.pad(w2s, ((0, 0), (0, Csp - Cs), (0, Cpo - Cout))).astype(bf16)

    skip_w = params.get("skip_w")
    if skip_w is None:                      # module omits the 1x1 conv when Cin == Cout
        skip_w = jnp.eye(Cout, Cin, dtype=f32)[:, :, None]
    wskip = jnp.pad(jnp.transpose(skip_w[:, :, 0].astype(f32), (1, 0)),
                    ((0, Cpi - Cin), (0, Cpo - Cout))).astype(bf16)

    s2 = params["bn2_g"].astype(f32) / jnp.sqrt(params["bn2_v"].astype(f32) + eps)
    b2 = params["bn2_b"].astype(f32) - params["bn2_m"].astype(f32) * s2
    s2 = jnp.pad(s2, (0, Cpo - Cout)).reshape(1, Cpo)
    b2 = jnp.pad(b2, (0, Cpo - Cout)).reshape(1, Cpo)

    kernel = _make_kernel(B, Kq, stride, Mrows, G_pad, Lout)

    flops = int(NB * (2 * MrowsT * Ck1p * Csp
                      + 2 * Kq * Mrows * Csp * Cpo
                      + 2 * Mrows * Cpi * Cpo))
    bytes_accessed = int(x1.size * 2 + yw.size * 2
                         + (w1mega.size + w2s.size + wskip.size) * 2
                         + (s2.size + b2.size) * 4
                         + 2 * N * Lout * Cpo * 2)

    grid_spec = pltpu.PrefetchScalarGridSpec(
        num_scalar_prefetch=0,
        grid=(NB,),
        in_specs=[
            pl.BlockSpec((None, MrowsT, Ck1p), lambda n: (n, 0, 0)),          # conv1 im2col
            pl.BlockSpec((None, stride, Mrows, Cpi), lambda n: (n, 0, 0, 0)),  # skip pool windows
            pl.BlockSpec((Ck1p, Csp), lambda n: (0, 0)),                      # conv1 mega weight
            pl.BlockSpec((Kq, Csp, Cpo), lambda n: (0, 0, 0)),                # conv2 super-taps
            pl.BlockSpec((Cpi, Cpo), lambda n: (0, 0)),                       # skip 1x1 weight
            pl.BlockSpec((1, Cpo), lambda n: (0, 0)),                         # bn2 scale
            pl.BlockSpec((1, Cpo), lambda n: (0, 0)),                         # bn2 shift
        ],
        out_specs=[
            pl.BlockSpec((B, Lout, Cpo), lambda n: (n, 0, 0)),
            pl.BlockSpec((B, Lout, Cpo), lambda n: (n, 0, 0)),
        ],
    )

    vmem_limit = int(min(56 << 20, max(32 << 20, 2 * footprint(B))))

    x_out_p, y_out_p = pl.pallas_call(
        kernel,
        out_shape=(jax.ShapeDtypeStruct((N, Lout, Cpo), bf16),
                   jax.ShapeDtypeStruct((N, Lout, Cpo), bf16)),
        grid_spec=grid_spec,
        compiler_params=pltpu.CompilerParams(
            dimension_semantics=("parallel",),
            vmem_limit_bytes=vmem_limit),
        cost_estimate=pl.CostEstimate(flops=flops, transcendentals=0,
                                      bytes_accessed=bytes_accessed),
    )(x1, yw, w1mega, w2s, wskip, s2, b2)

    x_out = jnp.transpose(x_out_p[:, :, :Cout], (0, 2, 1)).astype(f32)
    y_out = jnp.transpose(y_out_p[:, :, :Cout], (0, 2, 1)).astype(f32)
    return x_out, y_out


def resblock1d_reference(x, y, params, *, kernel_size, downsample, eps=1e-5):
    """Pure-JAX f32 reference (NCL layout), used only for correctness checking."""
    K = kernel_size
    pad1 = _padding(1, K)
    pad2 = _padding(downsample, K)
    dn = ("NCH", "OIH", "NCH")
    hp = jax.lax.Precision.HIGHEST

    def bn(t, g, b, m, v):
        s = g / jnp.sqrt(v + eps)
        sh = b - m * s
        return t * s[None, :, None] + sh[None, :, None]

    N, Cin, L = y.shape
    Lp = (L // downsample) * downsample
    ypool = y[:, :, :Lp].reshape(N, Cin, Lp // downsample, downsample).max(axis=-1)
    yskip = lax.conv_general_dilated(ypool, params["skip_w"], (1,), "VALID",
                                     dimension_numbers=dn, precision=hp)

    h = lax.conv_general_dilated(x, params["conv1_w"], (1,), [(pad1, pad1)],
                                 dimension_numbers=dn, precision=hp)
    h = jnp.maximum(bn(h, params["bn1_g"], params["bn1_b"], params["bn1_m"], params["bn1_v"]), 0.0)
    h = lax.conv_general_dilated(h, params["conv2_w"], (downsample,), [(pad2, pad2)],
                                 dimension_numbers=dn, precision=hp)
    x2 = h + yskip
    xo = jnp.maximum(bn(x2, params["bn2_g"], params["bn2_b"], params["bn2_m"], params["bn2_v"]), 0.0)
    return xo, x2


if __name__ == "__main__":
    N, Cin, Cout, L = 2, 4, 8, 16
    kernel_size, downsample = 3, 2          # dropout_rate is irrelevant in eval mode

    key = jax.random.PRNGKey(0)
    ks = jax.random.split(key, 12)
    x = jax.random.normal(ks[0], (N, Cin, L), jnp.float32)
    y = jax.random.normal(ks[1], (N, Cin, L), jnp.float32)

    params = {
        "conv1_w": 0.3 * jax.random.normal(ks[2], (Cout, Cin, kernel_size), jnp.float32),
        "conv2_w": 0.3 * jax.random.normal(ks[3], (Cout, Cout, kernel_size), jnp.float32),
        "skip_w":  0.3 * jax.random.normal(ks[4], (Cout, Cin, 1), jnp.float32),
        "bn1_g": 1.0 + 0.1 * jax.random.normal(ks[5], (Cout,), jnp.float32),
        "bn1_b": 0.1 * jax.random.normal(ks[6], (Cout,), jnp.float32),
        "bn1_m": 0.1 * jax.random.normal(ks[7], (Cout,), jnp.float32),
        "bn1_v": 1.0 + 0.1 * jax.random.uniform(ks[8], (Cout,), jnp.float32),
        "bn2_g": 1.0 + 0.1 * jax.random.normal(ks[9], (Cout,), jnp.float32),
        "bn2_b": 0.1 * jax.random.normal(ks[10], (Cout,), jnp.float32),
        "bn2_m": 0.1 * jax.random.normal(ks[11], (Cout,), jnp.float32),
        "bn2_v": 1.5 * jnp.ones((Cout,), jnp.float32),
    }

    x_out, y_out = resblock1d_forward(x, y, params,
                                      kernel_size=kernel_size, downsample=downsample)
    jax.block_until_ready((x_out, y_out))

    x_exp, y_exp = resblock1d_reference(x, y, params,
                                        kernel_size=kernel_size, downsample=downsample)
    assert x_out.shape == (N, Cout, L // downsample)
    assert y_out.shape == (N, Cout, L // downsample)
    # Tolerance reflects bf16 MXU operands (f32 accumulation) and bf16 kernel outputs.
    np.testing.assert_allclose(np.asarray(x_out), np.asarray(x_exp), rtol=5e-2, atol=6e-2)
    np.testing.assert_allclose(np.asarray(y_out), np.asarray(y_exp), rtol=5e-2, atol=6e-2)

    print("KERNEL_OK")
</pallas_src>

<mosaic_0001>
module attributes {stable_mosaic.version = 11 : i64} {
  func.func @kernel(%arg0: i32, %arg1: memref<1x32x128xbf16, #tpu.memory_space<vmem>>, %arg2: memref<1x2x16x128xbf16, #tpu.memory_space<vmem>>, %arg3: memref<128x128xbf16, #tpu.memory_space<vmem>>, %arg4: memref<2x128x128xbf16, #tpu.memory_space<vmem>>, %arg5: memref<128x128xbf16, #tpu.memory_space<vmem>>, %arg6: memref<1x128xf32, #tpu.memory_space<vmem>>, %arg7: memref<1x128xf32, #tpu.memory_space<vmem>>, %arg8: memref<1x8x128xbf16, #tpu.memory_space<vmem>>, %arg9: memref<1x8x128xbf16, #tpu.memory_space<vmem>>) attributes {dimension_semantics = [#tpu.dimension_semantics<parallel>], iteration_bounds = array<i64: 2>, scalar_prefetch = 0 : i64, scratch_operands = 0 : i64, tpu.core_type = #tpu.core_type<tc>, window_params = [{transform_indices = @transform_0, window_bounds = array<i64: 1, 32, 128>}, {transform_indices = @transform_1, window_bounds = array<i64: 1, 2, 16, 128>}, {pipeline_mode = #tpu.pipeline_mode<synchronous>, transform_indices = @transform_2, window_bounds = array<i64: 128, 128>}, {pipeline_mode = #tpu.pipeline_mode<synchronous>, transform_indices = @transform_3, window_bounds = array<i64: 2, 128, 128>}, {pipeline_mode = #tpu.pipeline_mode<synchronous>, transform_indices = @transform_4, window_bounds = array<i64: 128, 128>}, {pipeline_mode = #tpu.pipeline_mode<synchronous>, transform_indices = @transform_5, window_bounds = array<i64: 1, 128>}, {pipeline_mode = #tpu.pipeline_mode<synchronous>, transform_indices = @transform_6, window_bounds = array<i64: 1, 128>}, {transform_indices = @transform_7, window_bounds = array<i64: 1, 8, 128>}, {transform_indices = @transform_8, window_bounds = array<i64: 1, 8, 128>}]} {
    %c0 = arith.constant 0 : index
    %c0_0 = arith.constant 0 : index
    %c0_1 = arith.constant 0 : index
    %0 = vector.load %arg1[%c0, %c0_0, %c0_1] : memref<1x32x128xbf16, #tpu.memory_space<vmem>>, vector<1x32x128xbf16>
    %1 = vector.shape_cast %0 : vector<1x32x128xbf16> to vector<32x128xbf16>
    %c0_2 = arith.constant 0 : index
    %c0_3 = arith.constant 0 : index
    %2 = vector.load %arg3[%c0_2, %c0_3] : memref<128x128xbf16, #tpu.memory_space<vmem>>, vector<128x128xbf16>
    %cst = arith.constant dense<0.000000e+00> : vector<32x128xf32>
    %3 = tpu.matmul %1, %2, %cst {dimension_numbers = #tpu.dot_dimension_numbers<[1], [0], [0], [1], [0, 0, 1, 1], [], []>} : vector<32x128xbf16>, vector<128x128xbf16>, vector<32x128xf32> -> vector<32x128xf32>
    %cst_4 = arith.constant 0.000000e+00 : f32
    %4 = vector.broadcast %cst_4 : f32 to vector<32x128xf32>
    %5 = arith.maximumf %3, %4 : vector<32x128xf32>
    %6 = arith.truncf %5 : vector<32x128xf32> to vector<32x128xbf16>
    %7 = vector.extract_strided_slice %6 {offsets = [0, 0], sizes = [16, 128], strides = [1, 1]} : vector<32x128xbf16> to vector<16x128xbf16>
    %c0_5 = arith.constant 0 : index
    %c0_6 = arith.constant 0 : index
    %c0_7 = arith.constant 0 : index
    %8 = vector.load %arg4[%c0_5, %c0_6, %c0_7] : memref<2x128x128xbf16, #tpu.memory_space<vmem>>, vector<1x128x128xbf16>
    %9 = vector.shape_cast %8 : vector<1x128x128xbf16> to vector<128x128xbf16>
    %cst_8 = arith.constant dense<0.000000e+00> : vector<16x128xf32>
    %10 = tpu.matmul %7, %9, %cst_8 {dimension_numbers = #tpu.dot_dimension_numbers<[1], [0], [0], [1], [0, 0, 1, 1], [], []>} : vector<16x128xbf16>, vector<128x128xbf16>, vector<16x128xf32> -> vector<16x128xf32>
    %11 = vector.extract_strided_slice %6 {offsets = [1, 0], sizes = [16, 128], strides = [1, 1]} : vector<32x128xbf16> to vector<16x128xbf16>
    %c1 = arith.constant 1 : index
    %c0_9 = arith.constant 0 : index
    %c0_10 = arith.constant 0 : index
    %12 = vector.load %arg4[%c1, %c0_9, %c0_10] : memref<2x128x128xbf16, #tpu.memory_space<vmem>>, vector<1x128x128xbf16>
    %13 = vector.shape_cast %12 : vector<1x128x128xbf16> to vector<128x128xbf16>
    %cst_11 = arith.constant dense<0.000000e+00> : vector<16x128xf32>
    %14 = tpu.matmul %11, %13, %cst_11 {dimension_numbers = #tpu.dot_dimension_numbers<[1], [0], [0], [1], [0, 0, 1, 1], [], []>} : vector<16x128xbf16>, vector<128x128xbf16>, vector<16x128xf32> -> vector<16x128xf32>
    %15 = arith.addf %10, %14 : vector<16x128xf32>
    %c0_12 = arith.constant 0 : index
    %c0_13 = arith.constant 0 : index
    %c0_14 = arith.constant 0 : index
    %c0_15 = arith.constant 0 : index
    %16 = vector.load %arg2[%c0_12, %c0_13, %c0_14, %c0_15] : memref<1x2x16x128xbf16, #tpu.memory_space<vmem>>, vector<1x1x16x128xbf16>
    %17 = vector.shape_cast %16 : vector<1x1x16x128xbf16> to vector<16x128xbf16>
    %c0_16 = arith.constant 0 : index
    %c1_17 = arith.constant 1 : index
    %c0_18 = arith.constant 0 : index
    %c0_19 = arith.constant 0 : index
    %18 = vector.load %arg2[%c0_16, %c1_17, %c0_18, %c0_19] : memref<1x2x16x128xbf16, #tpu.memory_space<vmem>>, vector<1x1x16x128xbf16>
    %19 = vector.shape_cast %18 : vector<1x1x16x128xbf16> to vector<16x128xbf16>
    %20 = arith.maximumf %17, %19 : vector<16x128xbf16>
    %c0_20 = arith.constant 0 : index
    %c0_21 = arith.constant 0 : index
    %21 = vector.load %arg5[%c0_20, %c0_21] : memref<128x128xbf16, #tpu.memory_space<vmem>>, vector<128x128xbf16>
    %cst_22 = arith.constant dense<0.000000e+00> : vector<16x128xf32>
    %22 = tpu.matmul %20, %21, %cst_22 {dimension_numbers = #tpu.dot_dimension_numbers<[1], [0], [0], [1], [0, 0, 1, 1], [], []>} : vector<16x128xbf16>, vector<128x128xbf16>, vector<16x128xf32> -> vector<16x128xf32>
    %23 = arith.addf %15, %22 : vector<16x128xf32>
    %c0_23 = arith.constant 0 : index
    %c0_24 = arith.constant 0 : index
    %24 = vector.load %arg6[%c0_23, %c0_24] : memref<1x128xf32, #tpu.memory_space<vmem>>, vector<1x128xf32>
    %c0_25 = arith.constant 0 : index
    %c0_26 = arith.constant 0 : index
    %25 = vector.load %arg7[%c0_25, %c0_26] : memref<1x128xf32, #tpu.memory_space<vmem>>, vector<1x128xf32>
    %26 = vector.extract_strided_slice %23 {offsets = [0, 0], sizes = [8, 128], strides = [1, 1]} : vector<16x128xf32> to vector<8x128xf32>
    %27 = arith.truncf %26 : vector<8x128xf32> to vector<8x128xbf16>
    %c0_27 = arith.constant 0 : index
    %c0_28 = arith.constant 0 : index
    %c0_29 = arith.constant 0 : index
    %28 = vector.load %arg9[%c0_27, %c0_28, %c0_29] : memref<1x8x128xbf16, #tpu.memory_space<vmem>>, vector<1x8x128xbf16>
    %29 = vector.shape_cast %28 : vector<1x8x128xbf16> to vector<8x128xbf16>
    %30 = vector.shape_cast %27 : vector<8x128xbf16> to vector<1x8x128xbf16>
    tpu.vector_store %arg9[%c0_27, %c0_28, %c0_29], %30 {strides = array<i32>} : memref<1x8x128xbf16, #tpu.memory_space<vmem>>, vector<1x8x128xbf16>,
    %31 = vector.broadcast %24 : vector<1x128xf32> to vector<8x128xf32>
    %32 = arith.mulf %26, %31 : vector<8x128xf32>
    %33 = vector.broadcast %25 : vector<1x128xf32> to vector<8x128xf32>
    %34 = arith.addf %32, %33 : vector<8x128xf32>
    %cst_30 = arith.constant 0.000000e+00 : f32
    %35 = vector.broadcast %cst_30 : f32 to vector<8x128xf32>
    %36 = arith.maximumf %34, %35 : vector<8x128xf32>
    %37 = arith.truncf %36 : vector<8x128xf32> to vector<8x128xbf16>
    %c0_31 = arith.constant 0 : index
    %c0_32 = arith.constant 0 : index
    %c0_33 = arith.constant 0 : index
    %38 = vector.load %arg8[%c0_31, %c0_32, %c0_33] : memref<1x8x128xbf16, #tpu.memory_space<vmem>>, vector<1x8x128xbf16>
    %39 = vector.shape_cast %38 : vector<1x8x128xbf16> to vector<8x128xbf16>
    %40 = vector.shape_cast %37 : vector<8x128xbf16> to vector<1x8x128xbf16>
    tpu.vector_store %arg8[%c0_31, %c0_32, %c0_33], %40 {strides = array<i32>} : memref<1x8x128xbf16, #tpu.memory_space<vmem>>, vector<1x8x128xbf16>,
    return
  }
  func.func @transform_0(%arg0: i32) -> (i32, i32, i32) {
    %c0_i32 = arith.constant 0 : i32
    %c0_i32_0 = arith.constant 0 : i32
    %c0_i32_1 = arith.constant 0 : i32
    return %arg0, %c0_i32, %c0_i32_0 : i32, i32, i32
  }
  func.func @transform_1(%arg0: i32) -> (i32, i32, i32, i32) {
    %c0_i32 = arith.constant 0 : i32
    %c0_i32_0 = arith.constant 0 : i32
    %c0_i32_1 = arith.constant 0 : i32
    %c0_i32_2 = arith.constant 0 : i32
    return %arg0, %c0_i32, %c0_i32_0, %c0_i32_1 : i32, i32, i32, i32
  }
  func.func @transform_2(%arg0: i32) -> (i32, i32) {
    %c0_i32 = arith.constant 0 : i32
    %c0_i32_0 = arith.constant 0 : i32
    %c0_i32_1 = arith.constant 0 : i32
    return %c0_i32, %c0_i32_0 : i32, i32
  }
  func.func @transform_3(%arg0: i32) -> (i32, i32, i32) {
    %c0_i32 = arith.constant 0 : i32
    %c0_i32_0 = arith.constant 0 : i32
    %c0_i32_1 = arith.constant 0 : i32
    %c0_i32_2 = arith.constant 0 : i32
    return %c0_i32, %c0_i32_0, %c0_i32_1 : i32, i32, i32
  }
  func.func @transform_4(%arg0: i32) -> (i32, i32) {
    %c0_i32 = arith.constant 0 : i32
    %c0_i32_0 = arith.constant 0 : i32
    %c0_i32_1 = arith.constant 0 : i32
    return %c0_i32, %c0_i32_0 : i32, i32
  }
  func.func @transform_5(%arg0: i32) -> (i32, i32) {
    %c0_i32 = arith.constant 0 : i32
    %c0_i32_0 = arith.constant 0 : i32
    %c0_i32_1 = arith.constant 0 : i32
    return %c0_i32, %c0_i32_0 : i32, i32
  }
  func.func @transform_6(%arg0: i32) -> (i32, i32) {
    %c0_i32 = arith.constant 0 : i32
    %c0_i32_0 = arith.constant 0 : i32
    %c0_i32_1 = arith.constant 0 : i32
    return %c0_i32, %c0_i32_0 : i32, i32
  }
  func.func @transform_7(%arg0: i32) -> (i32, i32, i32) {
    %c0_i32 = arith.constant 0 : i32
    %c0_i32_0 = arith.constant 0 : i32
    %c0_i32_1 = arith.constant 0 : i32
    return %arg0, %c0_i32, %c0_i32_0 : i32, i32, i32
  }
  func.func @transform_8(%arg0: i32) -> (i32, i32, i32) {
    %c0_i32 = arith.constant 0 : i32
    %c0_i32_0 = arith.constant 0 : i32
    %c0_i32_1 = arith.constant 0 : i32
    return %arg0, %c0_i32, %c0_i32_0 : i32, i32, i32
  }
}

</mosaic_0001>

<bundles_post_ra>
// kernel: tpu_custom_call.1
= control target key start
LH: loop header
LB: loop body
LE: loop exit
PB: predicated region body
PF: predicated region fallthrough
CT: control target
= control target key end

     0   :  { %s2128_s0 = inlined_call_operand.hbm [shape: bf16[2,32,128], index: 0, kind: input, shape index: {}]   ;;  %s2129_s1 = inlined_call_operand.hbm [shape: bf16[2,2,16,128], index: 1, kind: input, shape index: {}]   ;;  %s2130_s2 = inlined_call_operand.hbm [shape: bf16[128,128], index: 2, kind: input, shape index: {}]   ;;  %s2131_s3 = inlined_call_operand.hbm [shape: bf16[2,128,128], index: 3, kind: input, shape index: {}]   ;;  %s2132_s4 = inlined_call_operand.hbm [shape: bf16[128,128], index: 4, kind: input, shape index: {}]   ;;  %s2133_s5 = inlined_call_operand.vmem [shape: f32[1,128], index: 5, kind: input, shape index: {}]   ;;  %s2134_s6 = inlined_call_operand.vmem [shape: f32[1,128], index: 6, kind: input, shape index: {}]   ;;  %s2135_s7 = inlined_call_operand.hbm [shape: bf16[2,8,128], index: 7, kind: output, shape index: {0}]   ;;  %s2136_s8 = inlined_call_operand.hbm [shape: bf16[2,8,128], index: 8, kind: output, shape index: {1}]  }
   0x1   :  { %2146 = sst [smem:[#allocation23_spill]] %s2128_s0 }
   0x2   :  { %2147 = sst [smem:[#allocation24_spill]] %s2130_s2 }
   0x3   :  { %2148 = sst [smem:[#allocation25_spill]] %s2131_s3 }
   0x4   :  { %2149 = sst [smem:[#allocation26_spill]] %s2132_s4 }
   0x5   :  { %14 = vsyncpa [#allocation3], 0 }
   0x6   :  { %16 = vsyncpa [#allocation3 + $0x1], 0 }
   0x7   :  { %17 = vsyncpa [#allocation6], 0 }
   0x8   :  { %19 = vsyncpa [#allocation6 + $0x1], 0 }
   0x9   :  { %20 = vsyncpa [#allocation9], 0 }
   0xa   :  { %21 = vsyncpa [#allocation4], 0 }
   0xb   :  { %23 = vsyncpa [#allocation4 + $0x1], 0 }
   0xc   :  { %24 = vsyncpa [#allocation13], 0 }
   0xd   :  { %26 = vsyncpa [#allocation13 + $0x1], 0  ;;  %s1727_s27 = smov 0   ;;  %s1729_s28 = smov 0  }
   0xe   :  { %s1731_s29 = smov 0   ;;  %s1733_s30 = smov 0  }
   0xf LB: > { %2150 = sst [smem:[#allocation20_spill]] %s1657_s27  ;;  %s1748_s9 = sadd.s32 4294967295, %s1669_s30   ;;  %s1669_s30 = sphi %s1733_s30, %s2181_s30   ;;  %s1665_s29 = sphi %s1731_s29, %s2180_s29   ;;  %s1661_s28 = sphi %s1729_s28, %s2179_s28   ;;  %s1657_s27 = sphi %s1727_s27, %s2178_s27  }
  0x10   : > { %s1101_s10 = sadd.s32 4294967294, %s1669_s30   ;;  %p52_p0 = scmp.ne.s32.totalorder %s1661_s28, %s1657_s27 }
  0x11   : > { %p2137_p1 = scmp.eq.s32.totalorder %s1748_s9, 0  ;;  %p213_p3 = scmp.eq.s32.totalorder %s1101_s10, 1 }
  0x12   : > { %p1102_p5 = scmp.ge.s32.totalorder %s1669_s30, 1  ;;  %p246_p7 = scmp.lt.s32.totalorder %s1669_s30, 3 }
  0x13   : > { %p1757_p4 = por %p2137_p1, %p52_p0  ;;  %p1762_p6 = por %p213_p3, %p52_p0 }
  0x14   : > { %p1767_p8 = pnand %p1102_p5, %p246_p7  ;;  %s1671_s14 = smov [#allocation7]  }
  0x15   : > { %s2151_s11 = scalar_select %p1757_p4, 1, 0 }
  0x16   : > { %s2152_s12 = scalar_select %p1762_p6, 1, 0 }
  0x17   : > { %s2154_s13 = scalar_select %p1767_p8, 1, 0 }
  0x18   : > { %2153 = sst [smem:[#allocation21_spill]] %s2152_s12  ;;  %s258_s15 = sshll.u32 %s1671_s14, 4  ;;  %s1771_s15 = int_to_ptr.vmem [resolvable:$true] %s258_s15 }
  0x19   : > { %p1310_p9 = pneg %p1767_p8  ;;  %s1672_s17 = smov [#allocation8]  }
  0x1a   : > { %s271_s18 = sshll.u32 %s1672_s17, 4  ;;  %s1673_s19 = smov [#allocation10]   ;;  %s1782_s18 = int_to_ptr.vmem [resolvable:$true] %s271_s18 }
  0x1b   : > { %p1778_p11 = pnand %p1310_p9, %p2137_p1  ;;  %s1784_s20 = sshll.u32 %s1673_s19, 4  ;;  %s285_s20 = int_to_ptr.vmem [resolvable:$true] %s1784_s20 }
  0x1c   : > { %s2156_s2 = sld [smem:[#allocation24_spill]] }
  0x1d   : > { %p1794_p13 = pneg %p1778_p11 }
  0x22   : > { %s1415_s23 = scalar_lea.hbm %s2156_s2, 1024 }
  0x23   : > { %p1416_p12 = scmp.ne.s32.totalorder %s2156_s2, %s1415_s23  ;;  %p1422_p5 = scmp.lt.u32.totalorder %s1415_s23, %s2156_s2 }
  0x25   : > { %p1418_p0 = pnand %p1794_p13, %p1416_p12 }
  0x27   : > { %p1419_p3 = pneg %p1418_p0 }
  0x29   : > { %p1424_p7 = pnand %p1422_p5, %p1419_p3 }
  0x2b   : > { %1427 = shalt.err (!%p1424_p7)
}
  0x2c   : > { %s1428_s17 = scalar_lea.vmem %s1771_s15, 1024  ;;  %p1436_p2 = scmp.lt.s32.totalorder %s1771_s15, %s1771_s15 }
  0x2d   : > { %p1429_p9 = scmp.ne.s32.totalorder %s1771_s15, %s1428_s17  ;;  %p1437_p6 = scmp.lt.s32.totalorder %s1428_s17, %s1428_s17 }
  0x2f   : > { %p1431_p10 = pnand %p1429_p9, %p1794_p13  ;;  %p1438_p12 = por %p1437_p6, %p1436_p2 }
  0x31   : > { %p1432_p1 = pneg %p1431_p10 }
  0x33   : > { %p1439_p0 = pnand %p1438_p12, %p1432_p1 }
  0x35   : > { %1442 = shalt.err (!%p1439_p0)
}
  0x36   : > { %s2142_s19 = smov 64   ;;  %s2144_s21 = smov 4  }
  0x37   : > { %1313 = dma.hbm_to_vmem [thread:$0]  (!%p1778_p11), %s2156_s2, 1024, %s1771_s15, [#allocation6], %s2142_s19, %s2142_s19, %s2144_s21  }
  0x38   : > { %s2158_s3 = sld [smem:[#allocation25_spill]] }
  0x3e   : > { %s1443_s10 = scalar_lea.hbm %s2158_s3, 2048 }
  0x3f   : > { %p1444_p1 = scmp.ne.s32.totalorder %s2158_s3, %s1443_s10  ;;  %p1450_p10 = scmp.lt.u32.totalorder %s1443_s10, %s2158_s3 }
  0x41   : > { %p1446_p2 = pnand %p1444_p1, %p1794_p13 }
  0x43   : > { %p1447_p6 = pneg %p1446_p2 }
  0x45   : > { %p1452_p3 = pnand %p1450_p10, %p1447_p6 }
  0x47   : > { %1455 = shalt.err (!%p1452_p3)
}
  0x48   : > { %s1456_s15 = scalar_lea.vmem %s1782_s18, 2048  ;;  %p1464_p12 = scmp.lt.s32.totalorder %s1782_s18, %s1782_s18 }
  0x49   : > { %p1457_p5 = scmp.ne.s32.totalorder %s1782_s18, %s1456_s15  ;;  %p1465_p0 = scmp.lt.s32.totalorder %s1456_s15, %s1456_s15 }
  0x4b   : > { %p1459_p7 = pnand %p1457_p5, %p1794_p13  ;;  %p1466_p1 = por %p1465_p0, %p1464_p12 }
  0x4d   : > { %p1460_p9 = pneg %p1459_p7 }
  0x4f   : > { %p1467_p2 = pnand %p1466_p1, %p1460_p9 }
  0x51   : > { %1470 = shalt.err (!%p1467_p2)
}
  0x52   : > { %1316 = dma.hbm_to_vmem [thread:$0]  (!%p1778_p11), %s2158_s3, 2048, %s1782_s18, [#allocation9], %s2142_s19, %s2142_s19, %s2144_s21  }
  0x53   : > { %s2159_s4 = sld [smem:[#allocation26_spill]] }
  0x59   : > { %s1471_s24 = scalar_lea.hbm %s2159_s4, 1024 }
  0x5a   : > { %p1472_p6 = scmp.ne.s32.totalorder %s2159_s4, %s1471_s24  ;;  %p1478_p5 = scmp.lt.u32.totalorder %s1471_s24, %s2159_s4 }
  0x5c   : > { %p1474_p10 = pnand %p1472_p6, %p1794_p13 }
  0x5e   : > { %p1475_p3 = pneg %p1474_p10 }
  0x60   : > { %p1480_p7 = pnand %p1478_p5, %p1475_p3 }
  0x62   : > { %1483 = shalt.err (!%p1480_p7)
}
  0x63   : > { %s1484_s15 = scalar_lea.vmem %s285_s20, 1024  ;;  %p1492_p1 = scmp.lt.s32.totalorder %s285_s20, %s285_s20 }
  0x64   : > { %p1485_p9 = scmp.ne.s32.totalorder %s285_s20, %s1484_s15  ;;  %p1493_p2 = scmp.lt.s32.totalorder %s1484_s15, %s1484_s15 }
  0x66   : > { %p1487_p12 = pnand %p1485_p9, %p1794_p13  ;;  %p1494_p4 = por %p1493_p2, %p1492_p1 }
  0x68   : > { %p1488_p0 = pneg %p1487_p12 }
  0x6a   : > { %p1495_p8 = pnand %p1494_p4, %p1488_p0 }
  0x6c   : > { %1498 = shalt.err (!%p1495_p8)
}
  0x6d   : > { %1319 = dma.hbm_to_vmem [thread:$0]  (!%p1778_p11), %s2159_s4, 1024, %s285_s20, [#allocation9], %s2142_s19, %s2142_s19, %s2144_s21  }
  0x6e   : > { %s1867_s26 = sadd.s32 1, %s1669_s30   ;;  %s39_s12 = sadd.s32 1, %s1665_s29 }
  0x6f   : > { %s36_s16 = ssub.s32 %s1669_s30, %s1867_s26  ;;  %p46_p8 = scmp.ne.s32.totalorder %s1665_s29, %s1661_s28 }
  0x70   : > { %p37_p4 = scmp.eq.s32.totalorder %s36_s16, 0  ;;  %p47_p13 = scmp.eq.s32.totalorder %s1669_s30, 0 }
  0x71   : > { %p1337_p6 = scmp.lt.s32.totalorder %s1669_s30, 2  ;;  %p2161_p3 = scmp.eq.s32.totalorder %s1748_s9, 1 }
  0x72   : > { %s1877_s22 = scalar_select %p37_p4, %s1665_s29, %s39_s12  }
  0x73   : > { %p48_p10 = por %p47_p13, %p46_p8  ;;  %p1881_p5 = por %p2161_p3, %p46_p8 }
  0x74   : > { %2160 = sst [smem:[#allocation22_spill]] %s1877_s22  ;;  %s304_s24 = sand.u32 1, %s1665_s29  }
  0x75   : > { %s1166_s25 = sshll.u32 %s1669_s30, 8  ;;  %s1887_s20 = sshll.u32 %s304_s24, 4 }
  0x76   : > { %s2163_s0 = sld [smem:[#allocation23_spill]]  ;;  %s308_s15 = scalar_lea.vmem [#allocation2], %s1887_s20 }
  0x77   : > { %s315_s18 = sshll.u32 %s308_s15, 4  ;;  %p1895_p11 = pnand %p1337_p6, %p48_p10  ;;  %s1899_s18 = int_to_ptr.vmem [resolvable:$true] %s315_s18 }
  0x78   : > { %s1904_s10 = scalar_lea.hbm %s2129_s1, %s1166_s25  ;;  %s1906_s14 = scalar_lea.sflag [#allocation3], %s304_s24 }
  0x79   : > { %p1501_p9 = pneg %p1895_p11 }
  0x7c   : > { %s1892_s17 = scalar_lea.hbm %s2163_s0, %s1166_s25  ;;  %s1504_s2 = scalar_lea.hbm %s2163_s0, 512 }
  0x7d   : > { %s1499_s19 = scalar_lea.hbm %s1892_s17, 256  ;;  %p1505_p1 = scmp.lt.u32.totalorder %s1892_s17, %s2163_s0 }
  0x7e   : > { %p1500_p7 = scmp.ne.s32.totalorder %s1892_s17, %s1499_s19  ;;  %p1506_p2 = scmp.lt.u32.totalorder %s1504_s2, %s1499_s19 }
  0x7f   : > { %p1508_p8 = scmp.lt.u32.totalorder %s1499_s19, %s1892_s17 }
  0x80   : > { %p1502_p12 = pnand %p1501_p9, %p1500_p7  ;;  %p1507_p4 = por %p1506_p2, %p1505_p1 }
  0x82   : > { %p1503_p0 = pneg %p1502_p12  ;;  %p1509_p13 = por %p1508_p8, %p1507_p4 }
  0x84   : > { %p1510_p6 = pnand %p1509_p13, %p1503_p0 }
  0x86   : > { %1513 = shalt.err (!%p1510_p6)
}
  0x87   : > { %s1514_s24 = scalar_lea.vmem %s1899_s18, 256  ;;  %s1676_s21 = smov [#allocation2]  }
  0x88   : > { %p1515_p10 = scmp.ne.s32.totalorder %s1899_s18, %s1514_s24  ;;  %s1519_s25 = sshll.u32 %s1676_s21, 4  ;;  %s1520_s25 = int_to_ptr.vmem [resolvable:$false] %s1519_s25 }
  0x89   : > { %s1521_s3 = scalar_lea.vmem %s1520_s25, 512  ;;  %p1522_p12 = scmp.lt.s32.totalorder %s1899_s18, %s1520_s25 }
  0x8a   : > { %p1517_p3 = pnand %p1515_p10, %p1501_p9  ;;  %p1523_p1 = scmp.lt.s32.totalorder %s1521_s3, %s1514_s24 }
  0x8c   : > { %p1518_p7 = pneg %p1517_p3  ;;  %p1524_p2 = por %p1523_p1, %p1522_p12 }
  0x8e   : > { %p1525_p4 = pnand %p1524_p2, %p1518_p7 }
  0x90   : > { %1528 = shalt.err (!%p1525_p4)
}
  0x91   : > { %s2165_s2 = smov 4   ;;  %s2166_s4 = smov 64  }
  0x92   : > { %1323 = dma.hbm_to_vmem [thread:$0]  (!%p1895_p11), %s1892_s17, 256, %s1899_s18, %s1906_s14, %s2166_s4, %s2166_s4, %s2165_s2  }
  0x93   : > { %s329_s19 = scalar_lea.vmem [#allocation5], %s1887_s20  ;;  %s325_s12 = sand.u32 1, %s1669_s30  }
  0x94   : > { %s336_s16 = sshll.u32 %s329_s19, 4  ;;  %s1941_s15 = scalar_lea.sflag [#allocation6], %s325_s12  ;;  %s1939_s16 = int_to_ptr.vmem [resolvable:$true] %s336_s16 }
  0x95   : > { %s1529_s24 = scalar_lea.hbm %s1904_s10, 256  ;;  %s1534_s3 = scalar_lea.hbm %s2129_s1, 512 }
  0x96   : > { %p1530_p0 = scmp.ne.s32.totalorder %s1904_s10, %s1529_s24  ;;  %p1535_p6 = scmp.lt.u32.totalorder %s1904_s10, %s2129_s1 }
  0x97   : > { %p1536_p10 = scmp.lt.u32.totalorder %s1534_s3, %s1529_s24  ;;  %p1538_p7 = scmp.lt.u32.totalorder %s1529_s24, %s1904_s10 }
  0x98   : > { %p1532_p8 = pnand %p1530_p0, %p1501_p9 }
  0x99   : > { %p1537_p3 = por %p1536_p10, %p1535_p6 }
  0x9a   : > { %p1533_p13 = pneg %p1532_p8 }
  0x9b   : > { %p1539_p12 = por %p1538_p7, %p1537_p3 }
  0x9d   : > { %p1540_p1 = pnand %p1539_p12, %p1533_p13 }
  0x9f   : > { %1543 = shalt.err (!%p1540_p1)
}
  0xa0   : > { %s1544_s20 = scalar_lea.vmem %s1939_s16, 256  ;;  %s1677_s17 = smov [#allocation5]  }
  0xa1   : > { %p1545_p2 = scmp.ne.s32.totalorder %s1939_s16, %s1544_s20  ;;  %s1549_s18 = sshll.u32 %s1677_s17, 4  ;;  %s1550_s18 = int_to_ptr.vmem [resolvable:$false] %s1549_s18 }
  0xa2   : > { %s1551_s0 = scalar_lea.vmem %s1550_s18, 512  ;;  %p1552_p8 = scmp.lt.s32.totalorder %s1939_s16, %s1550_s18 }
  0xa3   : > { %p1547_p4 = pnand %p1545_p2, %p1501_p9  ;;  %p1553_p6 = scmp.lt.s32.totalorder %s1551_s0, %s1544_s20 }
  0xa5   : > { %p1548_p0 = pneg %p1547_p4  ;;  %p1554_p10 = por %p1553_p6, %p1552_p8 }
  0xa7   : > { %p1555_p3 = pnand %p1554_p10, %p1548_p0 }
  0xa9   : > { %1558 = shalt.err (!%p1555_p3)
}
  0xaa   : > { %1326 = dma.hbm_to_vmem [thread:$0]  (!%p1895_p11), %s1904_s10, 256, %s1939_s16, %s1941_s15, %s2166_s4, %s2166_s4, %s2165_s2  }
  0xab   : > { %p2167_p9 = scmp.ne.s32.totalorder %s2154_s13, 0 }
  0xac   : > { %s1973_s22 = sand.u32 (!%p2167_p9), 1, %s1661_s28   ;;  %p2168_p13 = scmp.ne.s32.totalorder (!%p2167_p9), %s2151_s11, 0 }
  0xad   : > { %348 = sbr.rel (%p2167_p9) target bundleno = 728 (0x2d8), region = 48  ;;  %s1114_s14 = sshll.u32 (!%p2167_p9), %s1973_s22, 4 }
  0xae   : > { %s351_s19 = scalar_lea.sflag (!%p2167_p9), [#allocation3], %s1973_s22  ;;  %s1977_s12 = scalar_lea.vmem (!%p2167_p9), [#allocation2], %s1114_s14 }
  0xb4   : > { %1632 = dma.done.wait (%p2168_p13), %s351_s19, 256  }
  0xb5   : > { %1634 = vsyncadd (%p2168_p13), %s351_s19, 4294967040  ;;  %s359_s27 = sand.u32 1, %s1748_s9   ;;  %s1984_s10 = scalar_lea.vmem [#allocation5], %s1114_s14 }
  0xb6   : > { %s360_s13 = scalar_lea.sflag [#allocation6], %s359_s27 }
  0xb7   : > { %1636 = dma.done.wait (%p2168_p13), %s360_s13, 256  }
  0xb8   : > { %1638 = vsyncadd (%p2168_p13), %s360_s13, 4294967040  ;;  %p2169_p11 = scmp.eq.s32.totalorder %s1748_s9, 0 }
  0xba   : > { %1640 = dma.done.wait (%p2169_p11), [#allocation6], 1024   ;;  %p2170_p7 = pmov %p2169_p11 }
  0xbc   : > { %1642 = vsyncadd (%p2170_p7), [#allocation6], 4294966272  ;;  %p2171_p12 = pmov %p2170_p7 }
  0xbd   : > { %p2172_p1 = pmov %p2170_p7 }
  0xbe   : > { %1644 = dma.done.wait (%p2171_p12), [#allocation9], 3072  }
  0xbf   : > { %1646 = vsyncadd (%p2172_p1), [#allocation9], 4294964224  ;;  %v1678_v0 = vmov 0.0   ;;  %v1381_v1 = vld [vmem:[#allocation7] sm:$0xff]   ;;  %v1382_v2 = vld [vmem:[#allocation7 + $0x8] sm:$0xff]   ;;  %vm1679_vm0 = vmmov 0  }
  0xc0   : > { %1245 = vmatprep.subr.bf16.mxu1 %v1678_v0  ;;  %1205 = vmatprep.subr.bf16.mxu0 %v1381_v1  ;;  %v1383_v3 = vld [vmem:[#allocation7 + $0x10] sm:$0xff]   ;;  %v1384_v4 = vld [vmem:[#allocation7 + $0x18] sm:$0xff]   ;;  %v1391_v6 = vld [vmem:[#allocation8] sm:$0xff]   ;;  %vm587_vm1 = vsmask.f32 7424  ;;  %s1119_s11 = sshll.u32 %s1973_s22, 2 }
  0xc1   : > { %1206 = vmatpush3.bf16.msra.mxu0 %v1381_v1  ;;  %v1389_v5 = vld [vmem:[%s1977_s12] sm:$0xff]   ;;  %1246 = vmatpush3.bf16.msra.mxu1 %v1391_v6  ;;  %v1392_v8 = vld [vmem:[#allocation8 + $0x8] sm:$0xff]   ;;  %v1396_v12 = vld [vmem:[#allocation8 + $0x18] sm:$0xff]   ;;  %s1162_s16 = sshll.u32 %s1748_s9, 6  ;;  %s417_s15 = scalar_lea.vmem [#allocation12], %s1119_s11 }
  0xc2   : > { %1207 = vmatprep.subr.bf16.mxu0 %v1382_v2  ;;  %1221 = vmatprep.mubr.bf16.mxu0 %v1389_v5  ;;  %v1385_v7 = vld [vmem:[#allocation7 + $0x20] sm:$0xff]   ;;  %v1386_v9 = vld [vmem:[#allocation7 + $0x28] sm:$0xff]   ;;  %v1394_v10 = vld [vmem:[#allocation8 + $0x10] sm:$0xff]   ;;  %s948_s24 = sshll.u32 %s417_s15, 4  ;;  %s2047_s17 = scalar_lea.hbm %s2136_s8, %s1162_s16  ;;  %s2049_s24 = int_to_ptr.vmem [resolvable:$true] %s948_s24 }
  0xc3   : > { %1247 = vmatprep.subr.bf16.mxu1 %v1678_v0  ;;  %v1387_v11 = vld [vmem:[#allocation7 + $0x30] sm:$0xff]   ;;  %v1388_v13 = vld [vmem:[#allocation7 + $0x38] sm:$0xff]   ;;  %v1398_v14 = vld [vmem:[#allocation8 + $0x20] sm:$0xff]   ;;  %1261 = vmatprep.mubr.msk.bf16.mxu1 %vm1679_vm0, %v1678_v0  ;;  %s2051_s18 = scalar_lea.vmem [#allocation11], %s1119_s11  ;;  %s922_s14 = scalar_lea.sflag [#allocation13], %s1973_s22 }
  0xc4   : > { %v1400_v15 = vld [vmem:[#allocation8 + $0x28] sm:$0xff]   ;;  %v1393_v17 = vld [vmem:[#allocation8 + $0x40] sm:$0xff]   ;;  %v1397_v19 = vld [vmem:[#allocation8 + $0x50] sm:$0xff]   ;;  %s935_s0 = sshll.u32 %s2051_s18, 4  ;;  %s1559_s19 = scalar_lea.vmem %s2049_s24, 64  ;;  %s2085_s0 = int_to_ptr.vmem [resolvable:$true] %s935_s0 }
  0xc5   : > { %1208 = vmatpush3.bf16.msra.mxu0 %v1382_v2  ;;  %1248 = vmatpush3.bf16.msra.mxu1 %v1392_v8  ;;  %v1390_v16 = vld [vmem:[%s1977_s12 + $0x8] sm:$0xff]   ;;  %v1401_v21 = vld [vmem:[#allocation8 + $0x60] sm:$0xff]   ;;  %v1402_v22 = vld [vmem:[#allocation8 + $0x30] sm:$0xff]   ;;  %p1560_p2 = scmp.ne.s32.totalorder %s2049_s24, %s1559_s19  ;;  %s1680_s12 = smov [#allocation12]  }
  0xc6   : > { %1209 = vmatprep.subr.bf16.mxu0 %v1383_v3  ;;  %1249 = vmatprep.subr.bf16.mxu1 %v1678_v0  ;;  %v1395_v18 = vld [vmem:[#allocation8 + $0x48] sm:$0xff]   ;;  %v1399_v20 = vld [vmem:[#allocation8 + $0x58] sm:$0xff]   ;;  %v1405_v25 = vld [vmem:[#allocation8 + $0x70] sm:$0xff]   ;;  %s1563_s27 = sshll.u32 %s1680_s12, 4  ;;  %s1564_s27 = int_to_ptr.vmem [resolvable:$false] %s1563_s27 }
  0xc7   : > { %v1403_v23 = vld [vmem:[#allocation8 + $0x68] sm:$0xff]   ;;  %v1404_v24 = vld [vmem:[#allocation8 + $0x38] sm:$0xff]   ;;  %v1406_v36 = vld [vmem:[#allocation10] sm:$0xff]   ;;  %p1561_p4 = pnand %p1560_p2, %p1881_p5  ;;  %s1565_s13 = scalar_lea.vmem %s1564_s27, 128 }
  0xc8   : > { %v1407_v26 = vld [vmem:[#allocation8 + $0x78] sm:$0xff]   ;;  %v1408_v40 = vld [vmem:[#allocation10 + $0x8] sm:$0xff]   ;;  %v1409_v45 = vld [vmem:[#allocation10 + $0x10] sm:$0xff]   ;;  %p1566_p8 = scmp.lt.s32.totalorder %s2049_s24, %s1564_s27  ;;  %p1567_p6 = scmp.lt.s32.totalorder %s1565_s13, %s1559_s19 }
  0xc9   : > { %1210 = vmatpush3.bf16.msra.mxu0 %v1383_v3  ;;  %1250 = vmatpush3.bf16.msra.mxu1 %v1394_v10  ;;  %v1410_v47 = vld [vmem:[#allocation10 + $0x18] sm:$0xff]   ;;  %v1411_v48 = vld [vmem:[#allocation10 + $0x20] sm:$0xff]   ;;  %v1412_v49 = vld [vmem:[#allocation10 + $0x28] sm:$0xff]   ;;  %p1562_p0 = pneg %p1561_p4 }
  0xca   : > { %1211 = vmatprep.subr.bf16.mxu0 %v1384_v4  ;;  %1251 = vmatprep.subr.bf16.mxu1 %v1678_v0  ;;  %v1413_v50 = vld [vmem:[#allocation10 + $0x30] sm:$0xff]   ;;  %v1147_v53 = vld [vmem:[%s1984_s10 + $0x8] sm:$0xf]  ;;  %v1148_v54 = vld [vmem:[%s1984_s10 + $0xc] sm:$0xf]  ;;  %p1568_p10 = por %p1567_p6, %p1566_p8 }
  0xcb   : > { %v777_v51 = vld [vmem:[%s1984_s10] sm:$0xf]  ;;  %v778_v52 = vld [vmem:[%s1984_s10 + $0x4] sm:$0xf]  ;;  %v1414_v57 = vld [vmem:[#allocation10 + $0x38] sm:$0xff]  }
  0xcc   : > { %v782_v55 = vmax.bf16 %v1147_v53, %v777_v51  ;;  %v783_v56 = vmax.bf16 %v1148_v54, %v778_v52  ;;  %v1158_v1 = vld [vmem:[%s2133_s5] ss:$0 sm:$0xff]  ;;  %p1569_p3 = pnand %p1568_p10, %p1562_p0 }
  0xcd   : > { %1212 = vmatpush3.bf16.msra.mxu0 %v1384_v4  ;;  %1252 = vmatpush3.bf16.msra.mxu1 %v1396_v12  ;;  %v1159_v3 = vld [vmem:[%s2134_s6] ss:$0 sm:$0xff] }
  0xce   : > { %1213 = vmatprep.subr.bf16.mxu0 %v1385_v7  ;;  %1253 = vmatprep.subr.bf16.mxu1 %v1678_v0  ;;  %v1149_v58 = vcombine.low %v782_v55, %v783_v56 }
  0xd1   : > { %1214 = vmatpush3.bf16.msra.mxu0 %v1385_v7  ;;  %1254 = vmatpush3.bf16.msra.mxu1 %v1398_v14 }
  0xd2   : > { %1215 = vmatprep.subr.bf16.mxu0 %v1386_v9  ;;  %1255 = vmatprep.subr.bf16.mxu1 %v1678_v0 }
  0xd5   : > { %1216 = vmatpush3.bf16.msra.mxu0 %v1386_v9  ;;  %1256 = vmatpush3.bf16.msra.mxu1 %v1400_v15 }
  0xd6   : > { %1217 = vmatprep.subr.bf16.mxu0 %v1387_v11  ;;  %1257 = vmatprep.subr.bf16.mxu1 %v1678_v0 }
  0xd9   : > { %1218 = vmatpush3.bf16.msra.mxu0 %v1387_v11  ;;  %1258 = vmatpush3.bf16.msra.mxu1 %v1402_v22 }
  0xda   : > { %1219 = vmatprep.subr.bf16.mxu0 %v1388_v13  ;;  %1259 = vmatprep.subr.bf16.mxu1 %v1678_v0 }
  0xdd   : > { %1220 = vmatpush3.bf16.msra.mxu0 %v1388_v13  ;;  %1260 = vmatpush3.bf16.msra.mxu1 %v1404_v24 }
  0xde   : > { %1225 = vmatprep.subr.bf16.mxu0 %v1678_v0  ;;  %1265 = vmatprep.subr.bf16.mxu1 %v1678_v0 }
  0xe0   : > { %1222 = vmatmul.mubr.bf16.vlgmr.msra.gmra.mrb[0].mxu0 %v1390_v16 }
  0xe1   : > { %1226 = vmatpush3.bf16.msra.mxu0 %v1393_v17  ;;  %1241 = vmatprep.mubr.msk.bf16.mxu0 %vm1679_vm0, %v1678_v0 }
  0xe2   : > { %1227 = vmatprep.subr.bf16.mxu0 %v1678_v0 }
  0xe5   : > { %1228 = vmatpush3.bf16.msra.mxu0 %v1395_v18 }
  0xe6   : > { %1229 = vmatprep.subr.bf16.mxu0 %v1678_v0 }
  0xe9   : > { %1230 = vmatpush3.bf16.msra.mxu0 %v1397_v19 }
  0xea   : > { %1231 = vmatprep.subr.bf16.mxu0 %v1678_v0 }
  0xed   : > { %1232 = vmatpush3.bf16.msra.mxu0 %v1399_v20 }
  0xee   : > { %1233 = vmatprep.subr.bf16.mxu0 %v1678_v0 }
  0xf1   : > { %1234 = vmatpush3.bf16.msra.mxu0 %v1401_v21 }
  0xf2   : > { %1235 = vmatprep.subr.bf16.mxu0 %v1678_v0 }
  0xf5   : > { %1236 = vmatpush3.bf16.msra.mxu0 %v1403_v23 }
  0xf6   : > { %1237 = vmatprep.subr.bf16.mxu0 %v1678_v0 }
  0xf9   : > { %1238 = vmatpush3.bf16.msra.mxu0 %v1405_v25 }
  0xfa   : > { %1239 = vmatprep.subr.bf16.mxu0 %v1678_v0 }
  0xfd   : > { %1240 = vmatpush3.bf16.msra.mxu0 %v1407_v26 }
 0x1b3   : > { %v1223_v27 = vpop.f32.mrb[0].mxu0 }
 0x1b4   : > { %v533_v28 = vpop.f32.mrb[1].mxu0  ;;  %v550_v30 = vmax.f32 %v1223_v27, 0.0 }
 0x1b5   : > { %v1224_v29 = vpop.f32.mrb[2].mxu0  ;;  %v548_v33 = vmax.f32 %v533_v28, 0.0 }
 0x1b6   : > { %v551_v31 = vmax.f32 %v1224_v29, 0.0  ;;  %v536_v32 = vpop.f32.mrb[3].mxu0 }
 0x1b7   : > { %v549_v34 = vmax.f32 %v536_v32, 0.0 }
 0x1b8   : > { %v553_v35 = vpack.c.bf16 %v551_v31, %v550_v30 }
 0x1b9   : > { %v552_v37 = vpack.c.bf16 %v549_v34, %v548_v33 }
 0x1ba   : > { %v596_v38 = vshll.u32 %v553_v35, 16 }
 0x1bb   : > { %v591_v39 = vshll.u32 %v552_v37, 16  ;;  %1262 = vmatmul.mubr.bf16.vlgmr.msra.gmra.mrb[0].mxu1 %v552_v37  ;;  %v589_v41 = vshrl.u32 %v552_v37, 16 }
 0x1bc   : > { %1266 = vmatpush3.bf16.msra.mxu1 %v1406_v36  ;;  %1281 = vmatprep.mubr.msk.bf16.mxu1 %vm1679_vm0, %v1678_v0  ;;  %v598_v43 = vrot.slane %v596_v38, 1 }
 0x1bd   : > { %v593_v42 = vrot.slane %v591_v39, 1  ;;  %1267 = vmatprep.subr.bf16.mxu1 %v1678_v0 }
 0x1bf   : > { %v594_v44 = vor.u32 %v593_v42, %v589_v41 }
 0x1c0   : > { %1268 = vmatpush3.bf16.msra.mxu1 %v1408_v40 }
 0x1c1   : > { %v599_v46 = vsel %vm587_vm1, %v594_v44, %v598_v43  ;;  %1269 = vmatprep.subr.bf16.mxu1 %v1678_v0 }
 0x1c2   : > { %1242 = vmatmul.mubr.bf16.vlgmr.msra.gmra.mrb[4].mxu0 %v599_v46 }
 0x1c4   : > { %1270 = vmatpush3.bf16.msra.mxu1 %v1409_v45 }
 0x1c5   : > { %1271 = vmatprep.subr.bf16.mxu1 %v1678_v0 }
 0x1c8   : > { %1272 = vmatpush3.bf16.msra.mxu1 %v1410_v47 }
 0x1c9   : > { %1273 = vmatprep.subr.bf16.mxu1 %v1678_v0 }
 0x1cc   : > { %1274 = vmatpush3.bf16.msra.mxu1 %v1411_v48 }
 0x1cd   : > { %1275 = vmatprep.subr.bf16.mxu1 %v1678_v0 }
 0x1d0   : > { %1276 = vmatpush3.bf16.msra.mxu1 %v1412_v49 }
 0x1d1   : > { %1277 = vmatprep.subr.bf16.mxu1 %v1678_v0 }
 0x1d4   : > { %1278 = vmatpush3.bf16.msra.mxu1 %v1413_v50 }
 0x1d5   : > { %1279 = vmatprep.subr.bf16.mxu1 %v1678_v0 }
 0x1d8   : > { %1280 = vmatpush3.bf16.msra.mxu1 %v1414_v57 }
 0x1db   : > { %1282 = vmatmul.mubr.bf16.vlgmr.msra.gmra.mrb[0].mxu1 %v1149_v58 }
 0x295   : > { %v683_v59 = vpop.f32.mrb[4].mxu0 }
 0x296   : > { %v1243_v60 = vpop.f32.mrb[5].mxu0 }
 0x297   : > { %v686_v61 = vpop.f32.mrb[6].mxu0 }
 0x298   : > { %v1244_v62 = vpop.f32.mrb[7].mxu0 }
 0x2ae   : > { %v888_v63 = vpop.f32.mrb[0].mxu1 }
 0x2af   : > { %v1285_v2 = vadd.f32 %v888_v63, %v683_v59  ;;  %v1283_v0 = vpop.f32.mrb[1].mxu1 }
 0x2b0   : > { %v891_v4 = vpop.f32.mrb[2].mxu1 }
 0x2b1   : > { %v897_v5 = vpack.c.bf16 %v1285_v2, %v1285_v2  ;;  %v905_v6 = vmul.f32 %v1285_v2, %v1158_v1  ;;  %v1284_v7 = vpop.f32.mrb[3].mxu1 }
 0x2b3   : > { %v912_v8 = vadd.f32 %v1159_v3, %v905_v6  ;;  %898 = vst [vmem:[%s417_s15] sm:$0xf] %v897_v5 }
 0x2b4   : > { %1572 = shalt.err (!%p1569_p3)
}
 0x2b5   : > { %s1573_s10 = scalar_lea.hbm %s2047_s17, 64  ;;  %s1577_s4 = scalar_lea.hbm %s2136_s8, 128 }
 0x2b6   : > { %p1574_p9 = scmp.ne.s32.totalorder %s2047_s17, %s1573_s10  ;;  %p1578_p7 = scmp.lt.u32.totalorder %s2047_s17, %s2136_s8 }
 0x2b7   : > { %p1579_p12 = scmp.lt.u32.totalorder %s1577_s4, %s1573_s10  ;;  %p1581_p2 = scmp.lt.u32.totalorder %s1573_s10, %s2047_s17 }
 0x2b8   : > { %p1575_p13 = pnand %p1574_p9, %p1881_p5 }
 0x2b9   : > { %p1580_p1 = por %p1579_p12, %p1578_p7 }
 0x2ba   : > { %p1576_p11 = pneg %p1575_p13 }
 0x2bb   : > { %p1582_p4 = por %p1581_p2, %p1580_p1 }
 0x2bd   : > { %p1583_p0 = pnand %p1582_p4, %p1576_p11 }
 0x2bf   : > { %1586 = shalt.err (!%p1583_p0)
}
 0x2c0   : > { %1307 = dma.vmem_to_hbm [thread:$0]  (%p1881_p5), %s2049_s24, 64, %s2047_s17, %s922_s14   ;;  %v913_v9 = vmax.f32 %v912_v8, 0.0 }
 0x2c1   : > { %s2081_s20 = scalar_lea.hbm %s2135_s7, %s1162_s16  ;;  %s917_s19 = scalar_lea.sflag [#allocation4], %s1973_s22 }
 0x2c2   : > { %v914_v10 = vpack.c.bf16 %v913_v9, %v913_v9  ;;  %s1587_s12 = scalar_lea.vmem %s2085_s0, 64  ;;  %s1681_s24 = smov [#allocation11]  }
 0x2c3   : > { %p1588_p8 = scmp.ne.s32.totalorder %s2085_s0, %s1587_s12  ;;  %s1591_s9 = sshll.u32 %s1681_s24, 4  ;;  %s1592_s9 = int_to_ptr.vmem [resolvable:$false] %s1591_s9 }
 0x2c4   : > { %915 = vst [vmem:[%s2051_s18] sm:$0xf] %v914_v10  ;;  %s1593_s17 = scalar_lea.vmem %s1592_s9, 128  ;;  %p1594_p3 = scmp.lt.s32.totalorder %s2085_s0, %s1592_s9 }
 0x2c5   : > { %p1589_p6 = pnand %p1588_p8, %p1881_p5  ;;  %p1595_p9 = scmp.lt.s32.totalorder %s1593_s17, %s1587_s12 }
 0x2c7   : > { %p1590_p10 = pneg %p1589_p6  ;;  %p1596_p13 = por %p1595_p9, %p1594_p3 }
 0x2c9   : > { %p1597_p11 = pnand %p1596_p13, %p1590_p10 }
 0x2cb   : > { %1600 = shalt.err (!%p1597_p11)
}
 0x2cc   : > { %s1601_s22 = scalar_lea.hbm %s2081_s20, 64  ;;  %s1605_s14 = scalar_lea.hbm %s2135_s7, 128 }
 0x2cd   : > { %p1602_p7 = scmp.ne.s32.totalorder %s2081_s20, %s1601_s22  ;;  %p1606_p2 = scmp.lt.u32.totalorder %s2081_s20, %s2135_s7 }
 0x2ce   : > { %p1607_p4 = scmp.lt.u32.totalorder %s1605_s14, %s1601_s22  ;;  %p1609_p8 = scmp.lt.u32.totalorder %s1601_s22, %s2081_s20 }
 0x2cf   : > { %p1603_p12 = pnand %p1602_p7, %p1881_p5 }
 0x2d0   : > { %p1608_p0 = por %p1607_p4, %p1606_p2 }
 0x2d1   : > { %p1604_p1 = pneg %p1603_p12 }
 0x2d2   : > { %p1610_p6 = por %p1609_p8, %p1608_p0 }
 0x2d4   : > { %p1611_p10 = pnand %p1610_p6, %p1604_p1 }
 0x2d6   : > { %1614 = shalt.err (!%p1611_p10)
}
 0x2d7   : > { %1306 = dma.vmem_to_hbm [thread:$0]  (%p1881_p5), %s2085_s0, 64, %s2081_s20, %s917_s19  }
 0x2d8 PF: > { %s2173_s10 = sld [smem:[#allocation20_spill]]  ;;  %s2174_s11 = sld [smem:[#allocation21_spill]] }
 0x2d9   : > { %p2176_p9 = scmp.ge.s32.totalorder %s1669_s30, 2 }
 0x2de   : > { %s960_s2 = sand.u32 1, %s2173_s10   ;;  %p2175_p3 = scmp.ne.s32.totalorder %s2174_s11, 0 }
 0x2df   : > { %s961_s4 = scalar_lea.sflag [#allocation4], %s960_s2 }
 0x2e0   : > { %p1328_p13 = pnand %p2176_p9, %p2175_p3 }
 0x2e2   : > { %1648 = dma.done.wait (!%p1328_p13), %s961_s4, 64  }
 0x2e3   : > { %1650 = vsyncadd (!%p1328_p13), %s961_s4, 4294967232  ;;  %s970_s15 = scalar_lea.sflag [#allocation13], %s960_s2 }
 0x2e4   : > { %1652 = dma.done.wait (!%p1328_p13), %s970_s15, 64  }
 0x2e5   : > { %1654 = vsyncadd (!%p1328_p13), %s970_s15, 4294967232  ;;  %s2177_s23 = sld [smem:[#allocation22_spill]]  ;;  %p29_p5 = scmp.ge.s32.totalorder %s1867_s26, 4  }
 0x2e6   : > { %s2178_s27 = smov %s1661_s28  ;;  %s2179_s28 = smov %s1665_s29 }
 0x2e7   : > { %s2181_s30 = smov %s1867_s26  ;;  %31 = sbr.rel (!%p29_p5) target bundleno = 15 (0xf), region = 137 }
 0x2eb   : > { %s2180_s29 = smov %s2177_s23 }
 0x2ee   :  { %975 = vsyncpa [#allocation3], 1 }
 0x2ef   :  { %977 = vsyncpa [#allocation3 + $0x1], 1 }
 0x2f0   :  { %978 = vsyncpa [#allocation6], 1 }
 0x2f1   :  { %980 = vsyncpa [#allocation6 + $0x1], 1 }
 0x2f2   :  { %981 = vsyncpa [#allocation9], 1 }
 0x2f3   :  { %982 = vsyncpa [#allocation4], 1 }
 0x2f4   :  { %984 = vsyncpa [#allocation4 + $0x1], 1 }
 0x2f5   :  { %985 = vsyncpa [#allocation13], 1 }
 0x2f6   :  { %987 = vsyncpa [#allocation13 + $0x1], 1 }

</bundles_post_ra>
